<compile_context>
chip_gen: v6e
topology: v6e:2x2x1
jax: 0.10.0
libtpu: 0.0.40
codegen_flags: <defaults>
</compile_context>

<pallas_src>
import functools
import math

import jax
import jax.numpy as jnp
from jax.experimental import pallas as pl
from jax.experimental.pallas import tpu as pltpu


# ---------------------------------------------------------------------------
# Kernel: one (TR, Dp) tile of rows per grid step
# ---------------------------------------------------------------------------
def _layernorm_kernel(x_ref, w_ref, b_ref, o_ref, *, eps, d_valid):
    x = x_ref[...].astype(jnp.float32)            # (TR, Dp), f32 in-register
    d_padded = x.shape[-1]
    inv_d = 1.0 / d_valid

    if d_padded == d_valid:
        # Lane-dense path (D is a multiple of 128): plain per-row mean.
        u = jnp.mean(x, axis=-1, keepdims=True)
        xc = x - u
    else:
        # D was zero-padded to Dp lanes in the wrapper; pad lanes of x are 0,
        # so sum(x)/D is the true mean.  Mask xc so pad lanes don't pollute
        # the variance.
        lane = jax.lax.broadcasted_iota(jnp.int32, x.shape, 1)
        valid = lane < d_valid
        u = jnp.sum(x, axis=-1, keepdims=True) * inv_d
        xc = jnp.where(valid, x - u, 0.0)

    s = jnp.sum(xc * xc, axis=-1, keepdims=True) * inv_d   # biased variance
    inv = jax.lax.rsqrt(s + eps)                            # EUP slot (free)

    w = w_ref[...].astype(jnp.float32)
    b = b_ref[...].astype(jnp.float32)
    o_ref[...] = (w * (xc * inv) + b).astype(o_ref.dtype)


def _round_up(v, m):
    return (v + m - 1) // m * m


# ---------------------------------------------------------------------------
# Wrapper: flatten leading dims, byte-sized row tiles, no row padding
# ---------------------------------------------------------------------------
def layer_norm(x, weight, bias, *, eps=1e-12, target_block_bytes=2 * 1024 * 1024):
    """TF-style LayerNorm over the last axis; matches the PyTorch module."""
    orig_shape = x.shape
    orig_dtype = x.dtype
    D = orig_shape[-1]
    R = int(math.prod(orig_shape[:-1]))

    x2 = x.reshape(R, D)
    w2 = weight.reshape(1, D)
    b2 = bias.reshape(1, D)

    # Lane padding only when D is not a multiple of 128 (keeps stores
    # unmasked / lane-dense).  Zero pad so sum(x)/D stays the true mean.
    Dp = _round_up(D, 128)
    if Dp != D:
        x2 = jnp.pad(x2, ((0, 0), (0, Dp - D)))
        w2 = jnp.pad(w2, ((0, 0), (0, Dp - D)))
        b2 = jnp.pad(b2, ((0, 0), (0, Dp - D)))

    # Row tile sized by bytes (~target_block_bytes per block), rounded to the
    # sublane-packing multiple of the input dtype (f32: 8, bf16: 16, int8: 32)
    # and clamped so we never allocate a block larger than the data needs.
    itemsize = jnp.dtype(orig_dtype).itemsize
    sub = max(8, 32 // itemsize)
    tr = max(sub, (target_block_bytes // (Dp * itemsize)) // sub * sub)
    tr = min(tr, _round_up(R, sub))

    grid = (pl.cdiv(R, tr),)

    cost = pl.CostEstimate(
        flops=7 * R * Dp,
        transcendentals=R,
        bytes_accessed=2 * R * Dp * itemsize,
    )

    out = pl.pallas_call(
        functools.partial(_layernorm_kernel, eps=eps, d_valid=D),
        out_shape=jax.ShapeDtypeStruct((R, Dp), orig_dtype),
        grid=grid,
        in_specs=[
            pl.BlockSpec((tr, Dp), lambda i: (i, 0)),   # x rows (tiled, ragged OK)
            pl.BlockSpec((1, Dp), lambda i: (0, 0)),    # weight (grid-invariant)
            pl.BlockSpec((1, Dp), lambda i: (0, 0)),    # bias   (grid-invariant)
        ],
        out_specs=pl.BlockSpec((tr, Dp), lambda i: (i, 0)),
        compiler_params=pltpu.CompilerParams(
            dimension_semantics=("parallel",),           # megacore-shard rows
            vmem_limit_bytes=32 * 1024 * 1024,
        ),
        cost_estimate=cost,
    )(x2, w2, b2)

    if Dp != D:
        out = out[:, :D]
    return out.reshape(orig_shape)


# ---------------------------------------------------------------------------
# Pure-JAX reference (mirrors the PyTorch forward, f32 math)
# ---------------------------------------------------------------------------
def _ref_layer_norm(x, w, b, eps=1e-12):
    x = x.astype(jnp.float32)
    w = w.astype(jnp.float32)
    b = b.astype(jnp.float32)
    u = jnp.mean(x, axis=-1, keepdims=True)
    s = jnp.mean((x - u) ** 2, axis=-1, keepdims=True)
    return w * ((x - u) / jnp.sqrt(s + eps)) + b


if __name__ == "__main__":
    key = jax.random.PRNGKey(0)
    kx, kw, kb, kx2, kx3 = jax.random.split(key, 5)

    # Shapes the module's forward implies: (seq, batch, hidden) activations.
    L, N, D = 8, 2, 128
    x = jax.random.normal(kx, (L, N, D), jnp.float32)
    weight = 1.0 + 0.1 * jax.random.normal(kw, (D,), jnp.float32)
    bias = 0.05 * jax.random.normal(kb, (D,), jnp.float32)

    out = jax.block_until_ready(layer_norm(x, weight, bias))
    ref = _ref_layer_norm(x, weight, bias)
    assert out.shape == x.shape and out.dtype == x.dtype
    assert jnp.allclose(out, ref, atol=1e-5, rtol=1e-5)

    # Second check: ragged row count + non-multiple-of-128 hidden dim,
    # exercising the lane-padded masked-reduction path.
    D2 = 32
    x_small = jax.random.normal(kx2, (3, 5, D2), jnp.float32)
    w_small = 1.0 + 0.1 * jax.random.normal(kw, (D2,), jnp.float32)
    b_small = 0.05 * jax.random.normal(kb, (D2,), jnp.float32)
    out_small = jax.block_until_ready(layer_norm(x_small, w_small, b_small))
    ref_small = _ref_layer_norm(x_small, w_small, b_small)
    assert jnp.allclose(out_small, ref_small, atol=1e-5, rtol=1e-5)

    # Third check: bf16 activations stay bf16 end-to-end (no wrapper casts);
    # kernel does the f32 math internally.
    x_bf16 = jax.random.normal(kx3, (L, N, D), jnp.float32).astype(jnp.bfloat16)
    w_bf16 = weight.astype(jnp.bfloat16)
    b_bf16 = bias.astype(jnp.bfloat16)
    out_bf16 = jax.block_until_ready(layer_norm(x_bf16, w_bf16, b_bf16))
    ref_bf16 = _ref_layer_norm(x_bf16, w_bf16, b_bf16)
    assert out_bf16.dtype == jnp.bfloat16
    assert jnp.allclose(out_bf16.astype(jnp.float32), ref_bf16, atol=5e-2, rtol=5e-2)

    print("KERNEL_OK")
</pallas_src>

<mosaic_0001>
module attributes {stable_mosaic.version = 11 : i64} {
  func.func @_layernorm_kernel(%arg0: i32, %arg1: memref<16x128xf32, #tpu.memory_space<vmem>>, %arg2: memref<1x128xf32, #tpu.memory_space<vmem>>, %arg3: memref<1x128xf32, #tpu.memory_space<vmem>>, %arg4: memref<16x128xf32, #tpu.memory_space<vmem>>) attributes {dimension_semantics = [#tpu.dimension_semantics<parallel>], iteration_bounds = array<i64: 1>, scalar_prefetch = 0 : i64, scratch_operands = 0 : i64, tpu.core_type = #tpu.core_type<tc>, window_params = [{transform_indices = @transform_0, window_bounds = array<i64: 16, 128>}, {pipeline_mode = #tpu.pipeline_mode<synchronous>, transform_indices = @transform_1, window_bounds = array<i64: 1, 128>}, {pipeline_mode = #tpu.pipeline_mode<synchronous>, transform_indices = @transform_2, window_bounds = array<i64: 1, 128>}, {transform_indices = @transform_3, window_bounds = array<i64: 16, 128>}]} {
    %c0 = arith.constant 0 : index
    %c0_0 = arith.constant 0 : index
    %0 = vector.load %arg1[%c0, %c0_0] : memref<16x128xf32, #tpu.memory_space<vmem>>, vector<16x128xf32>
    %cst = arith.constant dense<0.000000e+00> : vector<16xf32>
    %1 = vector.multi_reduction <add>, %0, %cst [1] : vector<16x128xf32> to vector<16xf32>
    %2 = vector.shape_cast %1 : vector<16xf32> to vector<16x1xf32>
    %cst_1 = arith.constant 1.280000e+02 : f32
    %3 = vector.broadcast %cst_1 : f32 to vector<16x1xf32>
    %4 = arith.divf %2, %3 : vector<16x1xf32>
    %5 = vector.broadcast %4 : vector<16x1xf32> to vector<16x128xf32>
    %6 = arith.subf %0, %5 : vector<16x128xf32>
    %7 = arith.mulf %6, %6 : vector<16x128xf32>
    %cst_2 = arith.constant dense<0.000000e+00> : vector<16xf32>
    %8 = vector.multi_reduction <add>, %7, %cst_2 [1] : vector<16x128xf32> to vector<16xf32>
    %9 = vector.shape_cast %8 : vector<16xf32> to vector<16x1xf32>
    %cst_3 = arith.constant 7.812500e-03 : f32
    %10 = vector.broadcast %cst_3 : f32 to vector<16x1xf32>
    %11 = arith.mulf %9, %10 : vector<16x1xf32>
    %cst_4 = arith.constant 9.99999996E-13 : f32
    %12 = vector.broadcast %cst_4 : f32 to vector<16x1xf32>
    %13 = arith.addf %11, %12 : vector<16x1xf32>
    %14 = math.rsqrt %13 : vector<16x1xf32>
    %c0_5 = arith.constant 0 : index
    %c0_6 = arith.constant 0 : index
    %15 = vector.load %arg2[%c0_5, %c0_6] : memref<1x128xf32, #tpu.memory_space<vmem>>, vector<1x128xf32>
    %c0_7 = arith.constant 0 : index
    %c0_8 = arith.constant 0 : index
    %16 = vector.load %arg3[%c0_7, %c0_8] : memref<1x128xf32, #tpu.memory_space<vmem>>, vector<1x128xf32>
    %17 = vector.broadcast %14 : vector<16x1xf32> to vector<16x128xf32>
    %18 = arith.mulf %6, %17 : vector<16x128xf32>
    %19 = vector.broadcast %15 : vector<1x128xf32> to vector<16x128xf32>
    %20 = arith.mulf %19, %18 : vector<16x128xf32>
    %21 = vector.broadcast %16 : vector<1x128xf32> to vector<16x128xf32>
    %22 = arith.addf %20, %21 : vector<16x128xf32>
    %c0_9 = arith.constant 0 : index
    %c0_10 = arith.constant 0 : index
    %23 = vector.load %arg4[%c0_9, %c0_10] : memref<16x128xf32, #tpu.memory_space<vmem>>, vector<16x128xf32>
    tpu.vector_store %arg4[%c0_9, %c0_10], %22 {strides = array<i32>} : memref<16x128xf32, #tpu.memory_space<vmem>>, vector<16x128xf32>,
    return
  }
  func.func @transform_0(%arg0: i32) -> (i32, i32) {
    %c0_i32 = arith.constant 0 : i32
    %c0_i32_0 = arith.constant 0 : i32
    return %arg0, %c0_i32 : i32, i32
  }
  func.func @transform_1(%arg0: i32) -> (i32, i32) {
    %c0_i32 = arith.constant 0 : i32
    %c0_i32_0 = arith.constant 0 : i32
    %c0_i32_1 = arith.constant 0 : i32
    return %c0_i32, %c0_i32_0 : i32, i32
  }
  func.func @transform_2(%arg0: i32) -> (i32, i32) {
    %c0_i32 = arith.constant 0 : i32
    %c0_i32_0 = arith.constant 0 : i32
    %c0_i32_1 = arith.constant 0 : i32
    return %c0_i32, %c0_i32_0 : i32, i32
  }
  func.func @transform_3(%arg0: i32) -> (i32, i32) {
    %c0_i32 = arith.constant 0 : i32
    %c0_i32_0 = arith.constant 0 : i32
    return %arg0, %c0_i32 : i32, i32
  }
}

</mosaic_0001>

<bundles_post_ra>
// kernel: tpu_custom_call.1
= control target key start
LH: loop header
LB: loop body
LE: loop exit
PB: predicated region body
PF: predicated region fallthrough
CT: control target
= control target key end

     0   :  { %8 = vsyncpa [#allocation3], 0  ;;  %s187_s0 = inlined_call_operand.hbm [shape: f32[16,128], index: 0, kind: input, shape index: {}]   ;;  %s188_s1 = inlined_call_operand.vmem [shape: f32[1,128], index: 1, kind: input, shape index: {}]   ;;  %s189_s2 = inlined_call_operand.vmem [shape: f32[1,128], index: 2, kind: input, shape index: {}]   ;;  %s190_s3 = inlined_call_operand.hbm [shape: f32[16,128], index: 3, kind: output, shape index: {}]  }
   0x1   :  { %9 = vsyncpa [#allocation4], 0  ;;  %s145_s12 = smov [#allocation2]  }
   0x2   :  { %s15_s13 = sshll.u32 %s145_s12, 4  ;;  %s16_s13 = int_to_ptr.vmem [resolvable:$true] %s15_s13 }
   0x3   :  { %s109_s14 = scalar_lea.vmem %s16_s13, 256  ;;  %p114_p1 = scmp.lt.s32.totalorder %s16_s13, %s16_s13 }
   0x4   :  { %p110_p0 = scmp.ne.s32.totalorder %s16_s13, %s109_s14  ;;  %p115_p2 = scmp.lt.s32.totalorder %s109_s14, %s109_s14 }
   0x6   :  { %p116_p3 = por %p115_p2, %p114_p1 }
   0x8   :  { %p117_p4 = pnand %p116_p3, %p110_p0 }
   0xa   :  { %120 = shalt.err (!%p117_p4)
}
   0xb   :  { %s146_s15 = smov 128   ;;  %s147_s16 = smov 8  }
   0xc   :  { %21 = dma.hbm_to_vmem [thread:$0]  %s187_s0, 256, %s16_s13, [#allocation3], %s146_s15, %s146_s15, %s147_s16  }
   0xd   :  { %141 = dma.done.wait [#allocation3], 256  }
   0xe   :  { %142 = vsyncadd [#allocation3], 4294967040  ;;  %v29_v0 = vld [vmem:[#allocation2] sm:$0xff]  ;;  %v30_v1 = vld [vmem:[#allocation2 + $0x8] sm:$0xff]  ;;  %s148_s22 = smov [#allocation5]  }
   0xf   :  { %31 = vadd.xlane.f32.xlu0 %v29_v0  ;;  %v91_v17 = vld [vmem:[%s188_s1] ss:$0 sm:$0xff]  ;;  %s79_s23 = sshll.u32 %s148_s22, 4  ;;  %s80_s23 = int_to_ptr.vmem [resolvable:$true] %s79_s23 }
  0x10   :  { %v92_v19 = vld [vmem:[%s189_s2] ss:$0 sm:$0xff]  ;;  %s121_s24 = scalar_lea.vmem %s80_s23, 256  ;;  %p126_p6 = scmp.lt.s32.totalorder %s80_s23, %s80_s23 }
  0x11   :  { %p122_p5 = scmp.ne.s32.totalorder %s80_s23, %s121_s24  ;;  %p127_p7 = scmp.lt.s32.totalorder %s121_s24, %s121_s24 }
  0x13   :  { %33 = vadd.xlane.f32.xlu0 %v30_v1  ;;  %p128_p8 = por %p127_p7, %p126_p6 }
  0x15   :  { %p129_p9 = pnand %p128_p8, %p122_p5 }
  0x98   :  { %v32_v2 = vpop.xlane.xlu0 %31 }
  0x99   :  { %v36_v3 = vmul.f32 0.0078125, %v32_v2 }
  0x9b   :  { %v38_v4 = vsub.f32 %v29_v0, %v36_v3 }
  0x9c   :  { %v34_v5 = vpop.xlane.xlu0 %33 }
  0x9d   :  { %v37_v6 = vmul.f32 0.0078125, %v34_v5  ;;  %v40_v7 = vmul.f32 %v38_v4, %v38_v4 }
  0x9f   :  { %v39_v8 = vsub.f32 %v30_v1, %v37_v6  ;;  %42 = vadd.xlane.f32.xlu1 %v40_v7 }
  0xa1   :  { %v41_v9 = vmul.f32 %v39_v8, %v39_v8 }
  0xa3   :  { %44 = vadd.xlane.f32.xlu1 %v41_v9 }
 0x128   :  { %v43_v10 = vpop.xlane.xlu1 %42 }
 0x129   :  { %v46_v11 = vmul.f32 0.0078125, %v43_v10 }
 0x12b   :  { %v48_v12 = vadd.f32 1e-12, %v46_v11 }
 0x12c   :  { %v45_v13 = vpop.xlane.xlu1 %44 }
 0x12d   :  { %97 = vrsqrt.f32 %v48_v12  ;;  %v47_v14 = vmul.f32 0.0078125, %v45_v13 }
 0x12f   :  { %v49_v15 = vadd.f32 1e-12, %v47_v14 }
 0x131   :  { %99 = vrsqrt.f32 %v49_v15 }
 0x13a   :  { %v98_v16 = vpop.eup %97 }
 0x13b   :  { %v54_v18 = vmul.f32 %v98_v16, %v38_v4 }
 0x13d   :  { %v62_v20 = vmul.f32 %v91_v17, %v54_v18 }
 0x13e   :  { %v100_v21 = vpop.eup %99 }
 0x13f   :  { %v55_v22 = vmul.f32 %v100_v21, %v39_v8  ;;  %v70_v23 = vadd.f32 %v92_v19, %v62_v20 }
 0x141   :  { %v63_v24 = vmul.f32 %v91_v17, %v55_v22  ;;  %72 = vst [vmem:[#allocation5] sm:$0xff] %v70_v23 }
 0x143   :  { %v71_v25 = vadd.f32 %v92_v19, %v63_v24 }
 0x145   :  { %73 = vst [vmem:[#allocation5 + $0x8] sm:$0xff] %v71_v25 }
 0x146   :  { %132 = shalt.err (!%p129_p9)
}
 0x147   :  { %85 = dma.vmem_to_hbm [thread:$0]  %s80_s23, 256, %s190_s3, [#allocation4], %s146_s15, %s146_s15, %s147_s16  }
 0x148   :  { %143 = dma.done.wait [#allocation4], 256  }
 0x149   :  { %144 = vsyncadd [#allocation4], 4294967040 }
 0x14a   :  { %89 = vsyncpa [#allocation3], 1 }
 0x14b   :  { %90 = vsyncpa [#allocation4], 1 }

</bundles_post_ra>
